<compile_context>
chip_gen: v5e
topology: v5e:2x2
jax: 0.10.0
libtpu: 0.0.40
codegen_flags: <defaults>
</compile_context>

<pallas_src>
import functools

import jax
import jax.numpy as jnp
from jax.experimental import pallas as pl
from jax.experimental.pallas import tpu as pltpu

LANE = 128
SUBLANE = 8


def _round_up(x: int, m: int) -> int:
    return ((x + m - 1) // m) * m


def _choose_tk(F: int, block_k: int) -> int:
    """K tile: must be a multiple of 128 (x block's lane dim) or the full F."""
    if F <= block_k:
        return F
    cand = (block_k // LANE) * LANE
    while cand >= LANE:
        if F % cand == 0:
            return cand
        cand -= LANE
    # TODO(synk): for very large F that is not 128-divisible, pad F to a
    # 128-multiple at prep time instead of falling back to a single full-F block.
    return F


def _linear_kernel(x_ref, w_ref, b_ref, o_ref):
    # x_ref: (tm, tk), w_ref: (tk, Cout), b_ref: (1, Cout) f32, o_ref: (tm, Cout) f32
    k = pl.program_id(1)
    partial = jnp.dot(x_ref[...], w_ref[...], preferred_element_type=jnp.float32)

    @pl.when(k == 0)
    def _():
        # Output block is resident across the k axis (constant index map),
        # so it doubles as the f32 accumulator.
        o_ref[...] = partial + b_ref[...]

    @pl.when(k > 0)
    def _():
        o_ref[...] = o_ref[...] + partial


def prepare_logreg_params(weight, bias, *, param_dtype=None):
    """One-time layout prep (hoisted out of the per-call forward path).

    weight: (C, F) in torch.nn.Linear layout, bias: (C,).
    Returns (w_t, bias2d):
      w_t   : (F, Cout) — transposed (native MXU (M,K)x(K,N) orientation),
              class dim padded to a 128 multiple only when C >= 64.
      bias2d: (1, Cout) f32.
    """
    C, F = weight.shape
    w_t = weight.T  # (F, C)
    Cout = _round_up(C, LANE) if C >= 64 else C  # tiny C: skip output write amplification
    if Cout != C:
        w_t = jnp.pad(w_t, ((0, 0), (0, Cout - C)))
        bias = jnp.pad(bias, (0, Cout - C))
    if param_dtype is not None:
        w_t = w_t.astype(param_dtype)
    bias2d = bias.reshape(1, Cout).astype(jnp.float32)
    return w_t, bias2d


@functools.partial(jax.jit, static_argnames=("n_classes", "block_m", "block_k"))
def logistic_regression_forward(x, w_t, bias2d, *, n_classes, block_m=512, block_k=2048):
    """x: (B, F); w_t: (F, Cout) prepared weight; bias2d: (1, Cout) f32 -> (B, n_classes) f32."""
    B, F = x.shape
    F2, Cout = w_t.shape
    assert F == F2, (F, F2)

    tk = _choose_tk(F, block_k)
    nk = pl.cdiv(F, tk)  # exact division by construction (or nk == 1)

    # Batch tile: multiple of 8 sublanes, shrunk until the streaming buffers fit
    # a conservative ~28 MiB budget (safe for v7x's 64 MiB VMEM per core).
    tm = max(SUBLANE, min(_round_up(block_m, SUBLANE), _round_up(B, SUBLANE)))

    def _stream_bytes(tm_):
        return (2 * tm_ * tk * x.dtype.itemsize          # x (double-buffered)
                + 2 * tm_ * Cout * 4                     # out (double-buffered)
                + 2 * tk * Cout * w_t.dtype.itemsize     # weight
                + 2 * SUBLANE * max(Cout, LANE) * 4)     # bias (tile-rounded)

    budget = 28 * 1024 * 1024
    while tm > SUBLANE and _stream_bytes(tm) > budget:
        tm = _round_up(tm // 2, SUBLANE)

    # Ragged batch axis: no jnp.pad of x.  OOB rows of the last block are read
    # as garbage but never stored (no cross-row reduction in the kernel).
    grid = (pl.cdiv(B, tm), nk)

    vmem_limit = int(min(64 * 1024 * 1024,
                         max(_stream_bytes(tm) + (4 << 20), 32 * 1024 * 1024)))

    cost = pl.CostEstimate(
        flops=2 * B * F * Cout,
        bytes_accessed=(B * F * x.dtype.itemsize
                        + F * Cout * w_t.dtype.itemsize
                        + Cout * 4
                        + B * Cout * 4),
        transcendentals=0,
    )

    out = pl.pallas_call(
        _linear_kernel,
        out_shape=jax.ShapeDtypeStruct((B, Cout), jnp.float32),
        grid=grid,
        in_specs=[
            pl.BlockSpec((tm, tk), lambda i, k: (i, k)),    # x: streamed over batch & K
            pl.BlockSpec((tk, Cout), lambda i, k: (k, 0)),  # weight: resident across batch
            pl.BlockSpec((1, Cout), lambda i, k: (0, 0)),   # bias: resident
        ],
        out_specs=pl.BlockSpec((tm, Cout), lambda i, k: (i, 0)),
        compiler_params=pltpu.CompilerParams(
            dimension_semantics=("parallel", "arbitrary"),  # batch megacore-shardable, K reduction
            vmem_limit_bytes=vmem_limit,
        ),
        cost_estimate=cost,
    )(x, w_t, bias2d)

    if Cout != n_classes:
        out = out[:, :n_classes]
    return out


if __name__ == "__main__":
    key = jax.random.PRNGKey(0)

    # --- Test 1: module's nominal shapes (small C -> unpadded output path) ---
    n_features, n_classes, batch = 32, 8, 8
    k1, k2, k3, k4, k5, k6 = jax.random.split(key, 6)
    x = jax.random.normal(k1, (batch, n_features), dtype=jnp.float32)
    weight = jax.random.normal(k2, (n_classes, n_features), dtype=jnp.float32) * 0.1
    bias = jax.random.normal(k3, (n_classes,), dtype=jnp.float32) * 0.1

    w_t, b2d = prepare_logreg_params(weight, bias)          # one-time prep
    out = logistic_regression_forward(x, w_t, b2d, n_classes=n_classes)
    out = jax.block_until_ready(out)
    ref = x @ weight.T + bias
    assert out.shape == (batch, n_classes)
    assert jnp.allclose(out, ref, atol=1e-5, rtol=1e-5)

    # --- Test 2: ragged batch + padded-C + K-tiled accumulation paths ---
    n_features2, n_classes2, batch2 = 256, 72, 13
    x2 = jax.random.normal(k4, (batch2, n_features2), dtype=jnp.float32)
    weight2 = jax.random.normal(k5, (n_classes2, n_features2), dtype=jnp.float32) * 0.1
    bias2 = jax.random.normal(k6, (n_classes2,), dtype=jnp.float32) * 0.1

    w_t2, b2d2 = prepare_logreg_params(weight2, bias2)
    out2 = logistic_regression_forward(x2, w_t2, b2d2, n_classes=n_classes2,
                                       block_m=8, block_k=128)
    out2 = jax.block_until_ready(out2)
    ref2 = x2 @ weight2.T + bias2
    assert out2.shape == (batch2, n_classes2)
    assert jnp.allclose(out2, ref2, atol=1e-4, rtol=1e-5)

    print("KERNEL_OK")
</pallas_src>

<mosaic_0001>
module attributes {stable_mosaic.version = 11 : i64} {
  func.func @_linear_kernel(%arg0: i32, %arg1: i32, %arg2: memref<8x32xf32, #tpu.memory_space<vmem>>, %arg3: memref<32x8xf32, #tpu.memory_space<vmem>>, %arg4: memref<1x8xf32, #tpu.memory_space<vmem>>, %arg5: memref<8x8xf32, #tpu.memory_space<vmem>>) attributes {dimension_semantics = [#tpu.dimension_semantics<parallel>, #tpu.dimension_semantics<arbitrary>], iteration_bounds = array<i64: 1, 1>, scalar_prefetch = 0 : i64, scratch_operands = 0 : i64, tpu.core_type = #tpu.core_type<tc>, window_params = [{transform_indices = @transform_0, window_bounds = array<i64: 8, 32>}, {transform_indices = @transform_1, window_bounds = array<i64: 32, 8>}, {pipeline_mode = #tpu.pipeline_mode<synchronous>, transform_indices = @transform_2, window_bounds = array<i64: 1, 8>}, {transform_indices = @transform_3, window_bounds = array<i64: 8, 8>}]} {
    %c0 = arith.constant 0 : index
    %c0_0 = arith.constant 0 : index
    %0 = vector.load %arg2[%c0, %c0_0] : memref<8x32xf32, #tpu.memory_space<vmem>>, vector<8x32xf32>
    %c0_1 = arith.constant 0 : index
    %c0_2 = arith.constant 0 : index
    %1 = vector.load %arg3[%c0_1, %c0_2] : memref<32x8xf32, #tpu.memory_space<vmem>>, vector<32x8xf32>
    %cst = arith.constant dense<0.000000e+00> : vector<8x8xf32>
    %2 = tpu.matmul %0, %1, %cst {dimension_numbers = #tpu.dot_dimension_numbers<[1], [0], [0], [1], [0, 0, 1, 1], [], []>} : vector<8x32xf32>, vector<32x8xf32>, vector<8x8xf32> -> vector<8x8xf32>
    %c0_i32 = arith.constant 0 : i32
    %3 = arith.cmpi eq, %arg1, %c0_i32 : i32
    %4 = arith.extui %3 : i1 to i32
    %c0_i32_3 = arith.constant 0 : i32
    %5 = arith.cmpi ne, %4, %c0_i32_3 : i32
    scf.if %5 {
      %c0_6 = arith.constant 0 : index
      %c0_7 = arith.constant 0 : index
      %9 = vector.load %arg4[%c0_6, %c0_7] : memref<1x8xf32, #tpu.memory_space<vmem>>, vector<1x8xf32>
      %10 = vector.broadcast %9 : vector<1x8xf32> to vector<8x8xf32>
      %11 = arith.addf %2, %10 : vector<8x8xf32>
      %c0_8 = arith.constant 0 : index
      %c0_9 = arith.constant 0 : index
      %12 = vector.load %arg5[%c0_8, %c0_9] : memref<8x8xf32, #tpu.memory_space<vmem>>, vector<8x8xf32>
      tpu.vector_store %arg5[%c0_8, %c0_9], %11 {strides = array<i32>} : memref<8x8xf32, #tpu.memory_space<vmem>>, vector<8x8xf32>,
    } else {
    }
    %c0_i32_4 = arith.constant 0 : i32
    %6 = arith.cmpi sgt, %arg1, %c0_i32_4 : i32
    %7 = arith.extui %6 : i1 to i32
    %c0_i32_5 = arith.constant 0 : i32
    %8 = arith.cmpi ne, %7, %c0_i32_5 : i32
    scf.if %8 {
      %c0_6 = arith.constant 0 : index
      %c0_7 = arith.constant 0 : index
      %9 = vector.load %arg5[%c0_6, %c0_7] : memref<8x8xf32, #tpu.memory_space<vmem>>, vector<8x8xf32>
      %10 = arith.addf %9, %2 : vector<8x8xf32>
      %c0_8 = arith.constant 0 : index
      %c0_9 = arith.constant 0 : index
      %11 = vector.load %arg5[%c0_8, %c0_9] : memref<8x8xf32, #tpu.memory_space<vmem>>, vector<8x8xf32>
      tpu.vector_store %arg5[%c0_8, %c0_9], %10 {strides = array<i32>} : memref<8x8xf32, #tpu.memory_space<vmem>>, vector<8x8xf32>,
    } else {
    }
    return
  }
  func.func @transform_0(%arg0: i32, %arg1: i32) -> (i32, i32) {
    %c0_i32 = arith.constant 0 : i32
    return %arg0, %arg1 : i32, i32
  }
  func.func @transform_1(%arg0: i32, %arg1: i32) -> (i32, i32) {
    %c0_i32 = arith.constant 0 : i32
    %c0_i32_0 = arith.constant 0 : i32
    return %arg1, %c0_i32 : i32, i32
  }
  func.func @transform_2(%arg0: i32, %arg1: i32) -> (i32, i32) {
    %c0_i32 = arith.constant 0 : i32
    %c0_i32_0 = arith.constant 0 : i32
    %c0_i32_1 = arith.constant 0 : i32
    return %c0_i32, %c0_i32_0 : i32, i32
  }
  func.func @transform_3(%arg0: i32, %arg1: i32) -> (i32, i32) {
    %c0_i32 = arith.constant 0 : i32
    %c0_i32_0 = arith.constant 0 : i32
    return %arg0, %c0_i32 : i32, i32
  }
}

</mosaic_0001>

<bundles_post_ra>
// kernel: logistic_regression_forward.1
= control target key start
LH: loop header
LB: loop body
LE: loop exit
PB: predicated region body
PF: predicated region fallthrough
CT: control target
= control target key end

     0   :  { %s150_s0 = inlined_call_operand.vmem [shape: f32[8,32], index: 0, kind: input, shape index: {}]   ;;  %s151_s1 = inlined_call_operand.vmem [shape: f32[32,8], index: 1, kind: input, shape index: {}]   ;;  %s152_s2 = inlined_call_operand.vmem [shape: f32[1,8], index: 2, kind: input, shape index: {}]   ;;  %s153_s3 = inlined_call_operand.hbm [shape: f32[8,8], index: 3, kind: output, shape index: {}]  }
   0x1   :  { %v19_v0 = vld [vmem:[%s151_s1 + $0x18] sm:$0xff]  ;;  %v18_v1 = vld [vmem:[%s151_s1 + $0x10] sm:$0xff]  ;;  %v17_v2 = vld [vmem:[%s151_s1 + $0x8] sm:$0xff] }
   0x2   :  { %36 = vmatpush.msra.mxu0 %v19_v0 }
   0x3   :  { %8 = vsyncpa [#allocation3], 0  ;;  %v16_v3 = vld [vmem:[%s151_s1] sm:$0xff]  ;;  %vm20_vm0 = vcmask 261120   ;;  %s108_s24 = smov [#allocation2]   ;;  %s70_s28 = sshll.u32 %s153_s3, 4  ;;  %s71_s28 = int_to_ptr.hbm [resolvable:$true] %s70_s28 }
   0x4   :  { %37 = vmatpush.msra.mxu0 %v18_v1  ;;  %v15_v4 = vld [vmem:[%s150_s0] sm:$0xff]  ;;  %s68_s25 = sshll.u32 %s108_s24, 4  ;;  %vm53_vm1 = vcmask 64512   ;;  %s69_s25 = int_to_ptr.vmem [resolvable:$true] %s68_s25 }
   0x5   :  { %v81_v5 = vld [vmem:[%s152_s2] ss:$0 sm:$0xff] }
   0x6   :  { %38 = vmatpush.msra.mxu0 %v17_v2 }
   0x8   :  { %39 = vmatpush.msra.mxu0 %v16_v3 }
   0x9   :  { %79 = vmatmul.msk.f32.vlgmr.msra.gmra.mxu0 %vm20_vm0, %v15_v4 }
  0x86   :  { %v41_v6 = vpop.f32.mrf.mxu0 }
  0x87   :  { %v52_v7 = vadd.f32 %v81_v5, %v41_v6 }
  0x89   :  { %54 = vst.msk [vmem:[#allocation2] sm:$0xff] %vm53_vm1, %v52_v7 }
  0x8a   :  { %73 = dma.vmem_to_hbm [thread:$0]  %s69_s25, 128, %s71_s28, [#allocation3]  }
  0x8b   :  { %106 = dma.done.wait [#allocation3], 128  }
  0x8c   :  { %107 = vsyncadd [#allocation3], 4294967168 }
  0x8d   :  { %78 = vsyncpa [#allocation3], 1 }

</bundles_post_ra>
